<compile_context>
chip_gen: v5e
topology: v5e:2x2
jax: 0.10.0
libtpu: 0.0.40
codegen_flags: <defaults>
</compile_context>

<pallas_src>
import functools

import jax
import jax.numpy as jnp
from jax.experimental import pallas as pl
from jax.experimental.pallas import tpu as pltpu


def _round_up(x, m):
    return (x + m - 1) // m * m


def _ffn2_kernel(x_ref, w1_ref, b1_ref, w2_ref, b2_ref, o_ref):
    # fc1: (tm, Din) @ (Din, H) on the MXU, f32 accumulation, f32 bias add.
    h = jnp.dot(x_ref[...], w1_ref[...],
                preferred_element_type=jnp.float32) + b1_ref[...]
    # dropout (inference / eval) -> identity.
    # fc2: cast the intermediate back to the compute dtype for the second MXU pass.
    h = h.astype(w2_ref.dtype)
    out = jnp.dot(h, w2_ref[...],
                  preferred_element_type=jnp.float32) + b2_ref[...]
    o_ref[...] = out.astype(o_ref.dtype)


def _fused_kernel(x_ref, w_ref, b_ref, o_ref):
    # Single fused GEMM: x @ (W1 @ W2) + (b1 @ W2 + b2).
    out = jnp.dot(x_ref[...], w_ref[...],
                  preferred_element_type=jnp.float32) + b_ref[...]
    o_ref[...] = out.astype(o_ref.dtype)


def gen_embeddings_linear(x, w1, b1, w2, b2, *, tm=256,
                          compute_dtype=jnp.bfloat16, fuse_layers=False):
    """x: (M, D_in); w1: (D_in, H); b1: (H,); w2: (H, D_out); b2: (D_out,).

    Weights are already stored transposed to (in_features, out_features).
    """
    M, d_in = x.shape
    h_dim = w1.shape[1]
    d_out = w2.shape[1]
    out_dtype = x.dtype

    # Lane-dense padding of every feature dim to a multiple of 128.
    d_in_p = _round_up(d_in, 128)
    h_p = _round_up(h_dim, 128)
    d_out_p = _round_up(d_out, 128)

    # Batch tile: multiple of the sublane-packing granularity of compute_dtype,
    # clamped for small batches; batch is zero-padded to a multiple of the tile.
    row_align = 8 * (4 // jnp.dtype(compute_dtype).itemsize)
    tm = _round_up(tm, row_align)
    tm_eff = min(tm, _round_up(M, row_align))
    m_p = _round_up(M, tm_eff)
    grid = (m_p // tm_eff,)

    compiler_params = pltpu.CompilerParams(
        dimension_semantics=("parallel",),
        vmem_limit_bytes=48 * 1024 * 1024,
    )

    # Padded, dtype-cast activations (zero pad -> padded rows/cols are inert).
    x_p = jnp.zeros((m_p, d_in_p), compute_dtype).at[:M, :d_in].set(
        x.astype(compute_dtype))

    if fuse_layers:
        # Inference-only algebraic fusion (dropout is identity, no nonlinearity).
        w_f = w1.astype(jnp.float32) @ w2.astype(jnp.float32)
        b_f = b1.astype(jnp.float32) @ w2.astype(jnp.float32) + b2.astype(jnp.float32)
        w_p = jnp.zeros((d_in_p, d_out_p), compute_dtype).at[:d_in, :d_out].set(
            w_f.astype(compute_dtype))
        b_p = jnp.zeros((1, d_out_p), jnp.float32).at[0, :d_out].set(b_f)

        out_p = pl.pallas_call(
            _fused_kernel,
            out_shape=jax.ShapeDtypeStruct((m_p, d_out_p), out_dtype),
            grid_spec=pltpu.PrefetchScalarGridSpec(
                num_scalar_prefetch=0,
                grid=grid,
                in_specs=[
                    pl.BlockSpec((tm_eff, d_in_p), lambda i: (i, 0)),   # x tile
                    pl.BlockSpec((d_in_p, d_out_p), lambda i: (0, 0)),  # fused W
                    pl.BlockSpec((1, d_out_p), lambda i: (0, 0)),       # fused b
                ],
                out_specs=pl.BlockSpec((tm_eff, d_out_p), lambda i: (i, 0)),
            ),
            compiler_params=compiler_params,
        )(x_p, w_p, b_p)
        return out_p[:M, :d_out]

    # Two-GEMM path faithful to the module structure (fc1 -> dropout -> fc2).
    w1_p = jnp.zeros((d_in_p, h_p), compute_dtype).at[:d_in, :h_dim].set(
        w1.astype(compute_dtype))
    b1_p = jnp.zeros((1, h_p), jnp.float32).at[0, :h_dim].set(
        b1.astype(jnp.float32))
    w2_p = jnp.zeros((h_p, d_out_p), compute_dtype).at[:h_dim, :d_out].set(
        w2.astype(compute_dtype))
    b2_p = jnp.zeros((1, d_out_p), jnp.float32).at[0, :d_out].set(
        b2.astype(jnp.float32))

    out_p = pl.pallas_call(
        _ffn2_kernel,
        out_shape=jax.ShapeDtypeStruct((m_p, d_out_p), out_dtype),
        grid_spec=pltpu.PrefetchScalarGridSpec(
            num_scalar_prefetch=0,
            grid=grid,
            in_specs=[
                pl.BlockSpec((tm_eff, d_in_p), lambda i: (i, 0)),   # x tile
                pl.BlockSpec((d_in_p, h_p), lambda i: (0, 0)),      # W1 (resident)
                pl.BlockSpec((1, h_p), lambda i: (0, 0)),           # b1 (f32)
                pl.BlockSpec((h_p, d_out_p), lambda i: (0, 0)),     # W2 (resident)
                pl.BlockSpec((1, d_out_p), lambda i: (0, 0)),       # b2 (f32)
            ],
            out_specs=pl.BlockSpec((tm_eff, d_out_p), lambda i: (i, 0)),
        ),
        compiler_params=compiler_params,
    )(x_p, w1_p, b1_p, w2_p, b2_p)
    return out_p[:M, :d_out]


def _init_linear_params(key, fan_in, fan_out):
    # Mimic torch.nn.Linear default init: U(-1/sqrt(fan_in), 1/sqrt(fan_in)).
    kw, kb = jax.random.split(key)
    bound = 1.0 / jnp.sqrt(jnp.float32(fan_in))
    # Weight stored already transposed to (fan_in, fan_out) for the kernel.
    w = jax.random.uniform(kw, (fan_in, fan_out), jnp.float32, -bound, bound)
    b = jax.random.uniform(kb, (fan_out,), jnp.float32, -bound, bound)
    return w, b


if __name__ == "__main__":
    # Small shapes consistent with the module (hidden_dim=512 as in the spec).
    batch, input_dim, hidden_dim, output_dim = 16, 64, 512, 32

    key = jax.random.PRNGKey(0)
    kx, k1, k2 = jax.random.split(key, 3)

    x = jax.random.normal(kx, (batch, input_dim), jnp.float32)
    w1, b1 = _init_linear_params(k1, input_dim, hidden_dim)
    w2, b2 = _init_linear_params(k2, hidden_dim, output_dim)

    run2 = jax.jit(functools.partial(gen_embeddings_linear, fuse_layers=False))
    run1 = jax.jit(functools.partial(gen_embeddings_linear, fuse_layers=True))

    out2 = jax.block_until_ready(run2(x, w1, b1, w2, b2))   # faithful 2-GEMM path
    out1 = jax.block_until_ready(run1(x, w1, b1, w2, b2))   # fused inference path

    # References using the same bf16-operand / f32-accumulation policy.
    cd = jnp.bfloat16
    xq, w1q, w2q = x.astype(cd), w1.astype(cd), w2.astype(cd)
    h_ref = jnp.dot(xq, w1q, preferred_element_type=jnp.float32) + b1
    ref2 = jnp.dot(h_ref.astype(cd), w2q, preferred_element_type=jnp.float32) + b2
    w_f = w1 @ w2
    b_f = b1 @ w2 + b2
    ref1 = jnp.dot(xq, w_f.astype(cd), preferred_element_type=jnp.float32) + b_f

    assert out2.shape == (batch, output_dim)
    assert out1.shape == (batch, output_dim)
    assert jnp.allclose(out2, ref2, atol=2e-2, rtol=2e-2)
    assert jnp.allclose(out1, ref1, atol=2e-2, rtol=2e-2)
    # Loose sanity check against the pure-f32 reference (bf16 operands).
    ref_f32 = (x @ w1 + b1) @ w2 + b2
    assert jnp.allclose(out2, ref_f32, atol=1e-1, rtol=1e-1)

    print("KERNEL_OK")
</pallas_src>

<mosaic_0001>
module attributes {stable_mosaic.version = 11 : i64} {
  func.func @_ffn2_kernel(%arg0: i32, %arg1: memref<16x128xbf16, #tpu.memory_space<vmem>>, %arg2: memref<128x512xbf16, #tpu.memory_space<vmem>>, %arg3: memref<1x512xf32, #tpu.memory_space<vmem>>, %arg4: memref<512x128xbf16, #tpu.memory_space<vmem>>, %arg5: memref<1x128xf32, #tpu.memory_space<vmem>>, %arg6: memref<16x128xf32, #tpu.memory_space<vmem>>) attributes {dimension_semantics = [#tpu.dimension_semantics<parallel>], iteration_bounds = array<i64: 1>, scalar_prefetch = 0 : i64, scratch_operands = 0 : i64, tpu.core_type = #tpu.core_type<tc>, window_params = [{transform_indices = @transform_0, window_bounds = array<i64: 16, 128>}, {pipeline_mode = #tpu.pipeline_mode<synchronous>, transform_indices = @transform_1, window_bounds = array<i64: 128, 512>}, {pipeline_mode = #tpu.pipeline_mode<synchronous>, transform_indices = @transform_2, window_bounds = array<i64: 1, 512>}, {pipeline_mode = #tpu.pipeline_mode<synchronous>, transform_indices = @transform_3, window_bounds = array<i64: 512, 128>}, {pipeline_mode = #tpu.pipeline_mode<synchronous>, transform_indices = @transform_4, window_bounds = array<i64: 1, 128>}, {transform_indices = @transform_5, window_bounds = array<i64: 16, 128>}]} {
    %c0 = arith.constant 0 : index
    %c0_0 = arith.constant 0 : index
    %0 = vector.load %arg1[%c0, %c0_0] : memref<16x128xbf16, #tpu.memory_space<vmem>>, vector<16x128xbf16>
    %c0_1 = arith.constant 0 : index
    %c0_2 = arith.constant 0 : index
    %1 = vector.load %arg2[%c0_1, %c0_2] : memref<128x512xbf16, #tpu.memory_space<vmem>>, vector<128x512xbf16>
    %cst = arith.constant dense<0.000000e+00> : vector<16x512xf32>
    %2 = tpu.matmul %0, %1, %cst {dimension_numbers = #tpu.dot_dimension_numbers<[1], [0], [0], [1], [0, 0, 1, 1], [], []>} : vector<16x128xbf16>, vector<128x512xbf16>, vector<16x512xf32> -> vector<16x512xf32>
    %c0_3 = arith.constant 0 : index
    %c0_4 = arith.constant 0 : index
    %3 = vector.load %arg3[%c0_3, %c0_4] : memref<1x512xf32, #tpu.memory_space<vmem>>, vector<1x512xf32>
    %4 = vector.broadcast %3 : vector<1x512xf32> to vector<16x512xf32>
    %5 = arith.addf %2, %4 : vector<16x512xf32>
    %6 = arith.truncf %5 : vector<16x512xf32> to vector<16x512xbf16>
    %c0_5 = arith.constant 0 : index
    %c0_6 = arith.constant 0 : index
    %7 = vector.load %arg4[%c0_5, %c0_6] : memref<512x128xbf16, #tpu.memory_space<vmem>>, vector<512x128xbf16>
    %cst_7 = arith.constant dense<0.000000e+00> : vector<16x128xf32>
    %8 = tpu.matmul %6, %7, %cst_7 {dimension_numbers = #tpu.dot_dimension_numbers<[1], [0], [0], [1], [0, 0, 1, 1], [], []>} : vector<16x512xbf16>, vector<512x128xbf16>, vector<16x128xf32> -> vector<16x128xf32>
    %c0_8 = arith.constant 0 : index
    %c0_9 = arith.constant 0 : index
    %9 = vector.load %arg5[%c0_8, %c0_9] : memref<1x128xf32, #tpu.memory_space<vmem>>, vector<1x128xf32>
    %10 = vector.broadcast %9 : vector<1x128xf32> to vector<16x128xf32>
    %11 = arith.addf %8, %10 : vector<16x128xf32>
    %c0_10 = arith.constant 0 : index
    %c0_11 = arith.constant 0 : index
    %12 = vector.load %arg6[%c0_10, %c0_11] : memref<16x128xf32, #tpu.memory_space<vmem>>, vector<16x128xf32>
    tpu.vector_store %arg6[%c0_10, %c0_11], %11 {strides = array<i32>} : memref<16x128xf32, #tpu.memory_space<vmem>>, vector<16x128xf32>,
    return
  }
  func.func @transform_0(%arg0: i32) -> (i32, i32) {
    %c0_i32 = arith.constant 0 : i32
    %c0_i32_0 = arith.constant 0 : i32
    return %arg0, %c0_i32 : i32, i32
  }
  func.func @transform_1(%arg0: i32) -> (i32, i32) {
    %c0_i32 = arith.constant 0 : i32
    %c0_i32_0 = arith.constant 0 : i32
    %c0_i32_1 = arith.constant 0 : i32
    return %c0_i32, %c0_i32_0 : i32, i32
  }
  func.func @transform_2(%arg0: i32) -> (i32, i32) {
    %c0_i32 = arith.constant 0 : i32
    %c0_i32_0 = arith.constant 0 : i32
    %c0_i32_1 = arith.constant 0 : i32
    return %c0_i32, %c0_i32_0 : i32, i32
  }
  func.func @transform_3(%arg0: i32) -> (i32, i32) {
    %c0_i32 = arith.constant 0 : i32
    %c0_i32_0 = arith.constant 0 : i32
    %c0_i32_1 = arith.constant 0 : i32
    return %c0_i32, %c0_i32_0 : i32, i32
  }
  func.func @transform_4(%arg0: i32) -> (i32, i32) {
    %c0_i32 = arith.constant 0 : i32
    %c0_i32_0 = arith.constant 0 : i32
    %c0_i32_1 = arith.constant 0 : i32
    return %c0_i32, %c0_i32_0 : i32, i32
  }
  func.func @transform_5(%arg0: i32) -> (i32, i32) {
    %c0_i32 = arith.constant 0 : i32
    %c0_i32_0 = arith.constant 0 : i32
    return %arg0, %c0_i32 : i32, i32
  }
}

</mosaic_0001>

<bundles_post_ra>
// kernel: gen_embeddings_linear.1
= control target key start
LH: loop header
LB: loop body
LE: loop exit
PB: predicated region body
PF: predicated region fallthrough
CT: control target
= control target key end

     0   :  { %s1315_s0 = inlined_call_operand.vmem [shape: bf16[16,128], index: 0, kind: input, shape index: {}]   ;;  %s1316_s1 = inlined_call_operand.vmem [shape: bf16[128,512], index: 1, kind: input, shape index: {}]   ;;  %s1317_s2 = inlined_call_operand.vmem [shape: f32[1,512], index: 2, kind: input, shape index: {}]   ;;  %s1318_s3 = inlined_call_operand.vmem [shape: bf16[512,128], index: 3, kind: input, shape index: {}]   ;;  %s1319_s4 = inlined_call_operand.vmem [shape: f32[1,128], index: 4, kind: input, shape index: {}]   ;;  %s1320_s5 = inlined_call_operand.hbm [shape: f32[16,128], index: 5, kind: output, shape index: {}]  }
   0x1   :  { %v745_v0 = vld [vmem:[%s1316_s1 + $0xe0] sm:$0xf]  ;;  %v918_v1 = vld [vmem:[%s1316_s1 + $0xec] sm:$0xf0]  ;;  %v916_v2 = vld [vmem:[%s1316_s1 + $0xe4] sm:$0xf] }
   0x2   :  { %v746_v3 = vor.u32 %v918_v1, %v745_v0  ;;  %v747_v4 = vld [vmem:[%s1316_s1 + $0xf0] sm:$0xf0]  ;;  %v753_v5 = vld [vmem:[%s1316_s1 + $0xe8] sm:$0xf]  ;;  %v919_v6 = vld [vmem:[%s1316_s1 + $0xf4] sm:$0xf0] }
   0x3   :  { %v750_v7 = vor.u32 %v916_v2, %v747_v4  ;;  %v754_v8 = vor.u32 %v919_v6, %v753_v5  ;;  %v917_v9 = vld [vmem:[%s1316_s1 + $0xec] sm:$0xf]  ;;  %v755_v10 = vld [vmem:[%s1316_s1 + $0xf8] sm:$0xf0]  ;;  %v729_v11 = vld [vmem:[%s1316_s1 + $0xc0] sm:$0xf] }
   0x4   :  { %231 = vmatpush.bf16.msra.mxu0 %v746_v3  ;;  %v758_v12 = vor.u32 %v917_v9, %v755_v10  ;;  %v914_v13 = vld [vmem:[%s1316_s1 + $0xcc] sm:$0xf0]  ;;  %v912_v14 = vld [vmem:[%s1316_s1 + $0xc4] sm:$0xf]  ;;  %v731_v15 = vld [vmem:[%s1316_s1 + $0xd0] sm:$0xf0] }
   0x5   :  { %245 = vmatpush.bf16.msra.mxu1 %v750_v7  ;;  %259 = vmatpush.bf16.msra.mxu2 %v754_v8  ;;  %v730_v16 = vor.u32 %v914_v13, %v729_v11  ;;  %v734_v17 = vor.u32 %v912_v14, %v731_v15  ;;  %v737_v18 = vld [vmem:[%s1316_s1 + $0xc8] sm:$0xf]  ;;  %v915_v19 = vld [vmem:[%s1316_s1 + $0xd4] sm:$0xf0]  ;;  %v913_v20 = vld [vmem:[%s1316_s1 + $0xcc] sm:$0xf] }
   0x6   :  { %273 = vmatpush.bf16.msra.mxu3 %v758_v12  ;;  %v738_v21 = vor.u32 %v915_v19, %v737_v18  ;;  %v739_v22 = vld [vmem:[%s1316_s1 + $0xd8] sm:$0xf0]  ;;  %v713_v23 = vld [vmem:[%s1316_s1 + $0xa0] sm:$0xf]  ;;  %v910_v24 = vld [vmem:[%s1316_s1 + $0xac] sm:$0xf0] }
   0x7   :  { %v742_v25 = vor.u32 %v913_v20, %v739_v22  ;;  %v908_v26 = vld [vmem:[%s1316_s1 + $0xa4] sm:$0xf]  ;;  %v715_v27 = vld [vmem:[%s1316_s1 + $0xb0] sm:$0xf0]  ;;  %v721_v28 = vld [vmem:[%s1316_s1 + $0xa8] sm:$0xf]  ;;  %v714_v29 = vor.u32 %v910_v24, %v713_v23 }
   0x8   :  { %232 = vmatpush.bf16.msra.mxu0 %v730_v16  ;;  %v911_v30 = vld [vmem:[%s1316_s1 + $0xb4] sm:$0xf0]  ;;  %v909_v31 = vld [vmem:[%s1316_s1 + $0xac] sm:$0xf]  ;;  %v723_v32 = vld [vmem:[%s1316_s1 + $0xb8] sm:$0xf0]  ;;  %v718_v33 = vor.u32 %v908_v26, %v715_v27 }
   0x9   :  { %246 = vmatpush.bf16.msra.mxu1 %v734_v17  ;;  %260 = vmatpush.bf16.msra.mxu2 %v738_v21  ;;  %v722_v34 = vor.u32 %v911_v30, %v721_v28  ;;  %v697_v35 = vld [vmem:[%s1316_s1 + $0x80] sm:$0xf]  ;;  %v906_v36 = vld [vmem:[%s1316_s1 + $0x8c] sm:$0xf0]  ;;  %v904_v37 = vld [vmem:[%s1316_s1 + $0x84] sm:$0xf]  ;;  %v726_v38 = vor.u32 %v909_v31, %v723_v32 }
   0xa   :  { %274 = vmatpush.bf16.msra.mxu3 %v742_v25  ;;  %v699_v39 = vld [vmem:[%s1316_s1 + $0x90] sm:$0xf0]  ;;  %v705_v40 = vld [vmem:[%s1316_s1 + $0x88] sm:$0xf]  ;;  %v907_v41 = vld [vmem:[%s1316_s1 + $0x94] sm:$0xf0]  ;;  %v698_v44 = vor.u32 %v906_v36, %v697_v35 }
   0xb   :  { %v905_v42 = vld [vmem:[%s1316_s1 + $0x8c] sm:$0xf]  ;;  %v707_v43 = vld [vmem:[%s1316_s1 + $0x98] sm:$0xf0]  ;;  %v702_v45 = vor.u32 %v904_v37, %v699_v39  ;;  %v706_v46 = vor.u32 %v907_v41, %v705_v40  ;;  %v681_v47 = vld [vmem:[%s1316_s1 + $0x60] sm:$0xf] }
   0xc   :  { %233 = vmatpush.bf16.msra.mxu0 %v714_v29  ;;  %v902_v48 = vld [vmem:[%s1316_s1 + $0x6c] sm:$0xf0]  ;;  %v900_v49 = vld [vmem:[%s1316_s1 + $0x64] sm:$0xf]  ;;  %v710_v50 = vor.u32 %v905_v42, %v707_v43  ;;  %v683_v51 = vld [vmem:[%s1316_s1 + $0x70] sm:$0xf0] }
   0xd   :  { %247 = vmatpush.bf16.msra.mxu1 %v718_v33  ;;  %261 = vmatpush.bf16.msra.mxu2 %v722_v34  ;;  %v689_v52 = vld [vmem:[%s1316_s1 + $0x68] sm:$0xf]  ;;  %v903_v53 = vld [vmem:[%s1316_s1 + $0x74] sm:$0xf0]  ;;  %v901_v54 = vld [vmem:[%s1316_s1 + $0x6c] sm:$0xf]  ;;  %v682_v56 = vor.u32 %v902_v48, %v681_v47  ;;  %v686_v57 = vor.u32 %v900_v49, %v683_v51 }
   0xe   :  { %275 = vmatpush.bf16.msra.mxu3 %v726_v38  ;;  %v691_v55 = vld [vmem:[%s1316_s1 + $0x78] sm:$0xf0]  ;;  %v690_v58 = vor.u32 %v903_v53, %v689_v52  ;;  %v665_v59 = vld [vmem:[%s1316_s1 + $0x40] sm:$0xf]  ;;  %v898_v60 = vld [vmem:[%s1316_s1 + $0x4c] sm:$0xf0] }
   0xf   :  { %v896_v61 = vld [vmem:[%s1316_s1 + $0x44] sm:$0xf]  ;;  %v694_v62 = vor.u32 %v901_v54, %v691_v55  ;;  %v667_v63 = vld [vmem:[%s1316_s1 + $0x50] sm:$0xf0]  ;;  %v673_v0 = vld [vmem:[%s1316_s1 + $0x48] sm:$0xf]  ;;  %v666_v4 = vor.u32 %v898_v60, %v665_v59 }
  0x10   :  { %234 = vmatpush.bf16.msra.mxu0 %v698_v44  ;;  %v899_v1 = vld [vmem:[%s1316_s1 + $0x54] sm:$0xf0]  ;;  %v897_v2 = vld [vmem:[%s1316_s1 + $0x4c] sm:$0xf]  ;;  %v675_v3 = vld [vmem:[%s1316_s1 + $0x58] sm:$0xf0]  ;;  %v670_v5 = vor.u32 %v896_v61, %v667_v63 }
  0x11   :  { %248 = vmatpush.bf16.msra.mxu1 %v702_v45  ;;  %262 = vmatpush.bf16.msra.mxu2 %v706_v46  ;;  %v674_v6 = vor.u32 %v899_v1, %v673_v0  ;;  %v649_v7 = vld [vmem:[%s1316_s1 + $0x20] sm:$0xf]  ;;  %v894_v8 = vld [vmem:[%s1316_s1 + $0x2c] sm:$0xf0]  ;;  %v892_v9 = vld [vmem:[%s1316_s1 + $0x24] sm:$0xf]  ;;  %v678_v10 = vor.u32 %v897_v2, %v675_v3 }
  0x12   :  { %276 = vmatpush.bf16.msra.mxu3 %v710_v50  ;;  %v651_v11 = vld [vmem:[%s1316_s1 + $0x30] sm:$0xf0]  ;;  %v657_v12 = vld [vmem:[%s1316_s1 + $0x28] sm:$0xf]  ;;  %v895_v13 = vld [vmem:[%s1316_s1 + $0x34] sm:$0xf0]  ;;  %v650_v16 = vor.u32 %v894_v8, %v649_v7 }
  0x13   :  { %v893_v14 = vld [vmem:[%s1316_s1 + $0x2c] sm:$0xf]  ;;  %v659_v15 = vld [vmem:[%s1316_s1 + $0x38] sm:$0xf0]  ;;  %v654_v17 = vor.u32 %v892_v9, %v651_v11  ;;  %v658_v18 = vor.u32 %v895_v13, %v657_v12  ;;  %v633_v19 = vld [vmem:[%s1316_s1] sm:$0xf] }
  0x14   :  { %235 = vmatpush.bf16.msra.mxu0 %v682_v56  ;;  %v890_v20 = vld [vmem:[%s1316_s1 + $0xc] sm:$0xf0]  ;;  %v888_v21 = vld [vmem:[%s1316_s1 + $0x4] sm:$0xf]  ;;  %v662_v22 = vor.u32 %v893_v14, %v659_v15  ;;  %v635_v23 = vld [vmem:[%s1316_s1 + $0x10] sm:$0xf0] }
  0x15   :  { %249 = vmatpush.bf16.msra.mxu1 %v686_v57  ;;  %263 = vmatpush.bf16.msra.mxu2 %v690_v58  ;;  %v641_v24 = vld [vmem:[%s1316_s1 + $0x8] sm:$0xf]  ;;  %v891_v25 = vld [vmem:[%s1316_s1 + $0x14] sm:$0xf0]  ;;  %v889_v26 = vld [vmem:[%s1316_s1 + $0xc] sm:$0xf]  ;;  %v634_v28 = vor.u32 %v890_v20, %v633_v19 }
  0x16   :  { %277 = vmatpush.bf16.msra.mxu3 %v694_v62  ;;  %v643_v27 = vld [vmem:[%s1316_s1 + $0x18] sm:$0xf0] }
  0x18   :  { %236 = vmatpush.bf16.msra.mxu0 %v666_v4 }
  0x19   :  { %250 = vmatpush.bf16.msra.mxu1 %v670_v5  ;;  %264 = vmatpush.bf16.msra.mxu2 %v674_v6 }
  0x1a   :  { %278 = vmatpush.bf16.msra.mxu3 %v678_v10 }
  0x1c   :  { %237 = vmatpush.bf16.msra.mxu0 %v650_v16 }
  0x1d   :  { %10 = vsyncpa [#allocation3], 0  ;;  %251 = vmatpush.bf16.msra.mxu1 %v654_v17  ;;  %265 = vmatpush.bf16.msra.mxu2 %v658_v18  ;;  %v638_v29 = vor.u32 %v888_v21, %v635_v23  ;;  %v642_v30 = vor.u32 %v891_v25, %v641_v24  ;;  %v646_v31 = vor.u32 %v889_v26, %v643_v27  ;;  %v927_v32 = vld [vmem:[%s1318_s3 + $0x38] sm:$0xff]  ;;  %v887_v33 = vld [vmem:[%s1315_s0] sm:$0xff]  ;;  %s982_s8 = smov [#allocation2]   ;;  %s615_s12 = sshll.u32 %s1320_s5, 4  ;;  %s616_s12 = int_to_ptr.hbm [resolvable:$true] %s615_s12 }
  0x1e   :  { %279 = vmatpush.bf16.msra.mxu3 %v662_v22  ;;  %v935_v34 = vld [vmem:[%s1318_s3 + $0x78] sm:$0xff]  ;;  %v926_v36 = vld [vmem:[%s1318_s3 + $0x30] sm:$0xff]  ;;  %v925_v40 = vld [vmem:[%s1318_s3 + $0x28] sm:$0xff]  ;;  %s613_s9 = sshll.u32 %s982_s8, 4  ;;  %s984_s13 = smov 8   ;;  %s614_s9 = int_to_ptr.vmem [resolvable:$true] %s613_s9 }
  0x1f   :  { %v943_v35 = vld [vmem:[%s1318_s3 + $0xb8] sm:$0xff]  ;;  %v934_v38 = vld [vmem:[%s1318_s3 + $0x70] sm:$0xff]  ;;  %v933_v42 = vld [vmem:[%s1318_s3 + $0x68] sm:$0xff] }
  0x20   :  { %238 = vmatpush.bf16.msra.mxu0 %v634_v28  ;;  %v951_v37 = vld [vmem:[%s1318_s3 + $0xf8] sm:$0xff]  ;;  %v942_v39 = vld [vmem:[%s1318_s3 + $0xb0] sm:$0xff]  ;;  %v941_v43 = vld [vmem:[%s1318_s3 + $0xa8] sm:$0xff] }
  0x21   :  { %252 = vmatpush.bf16.msra.mxu1 %v638_v29  ;;  %266 = vmatpush.bf16.msra.mxu2 %v642_v30  ;;  %v950_v41 = vld [vmem:[%s1318_s3 + $0xf0] sm:$0xff]  ;;  %v924_v44 = vld [vmem:[%s1318_s3 + $0x20] sm:$0xff]  ;;  %v949_v45 = vld [vmem:[%s1318_s3 + $0xe8] sm:$0xff] }
  0x22   :  { %280 = vmatpush.bf16.msra.mxu3 %v646_v31  ;;  %v932_v46 = vld [vmem:[%s1318_s3 + $0x60] sm:$0xff]  ;;  %v923_v47 = vld [vmem:[%s1318_s3 + $0x18] sm:$0xff]  ;;  %v922_v51 = vld [vmem:[%s1318_s3 + $0x10] sm:$0xff] }
  0x23   :  { %239 = vmatmul.bf16.vlgmr.msra.gmra.mxu0 %v887_v33  ;;  %v931_v48 = vld [vmem:[%s1318_s3 + $0x58] sm:$0xff]  ;;  %v940_v49 = vld [vmem:[%s1318_s3 + $0xa0] sm:$0xff]  ;;  %v930_v52 = vld [vmem:[%s1318_s3 + $0x50] sm:$0xff] }
  0x24   :  { %551 = vmatpush.bf16.msrb.mxu0 %v927_v32  ;;  %253 = vmatmul.bf16.vlgmr.msra.gmra.mxu1 %v887_v33  ;;  %v948_v50 = vld [vmem:[%s1318_s3 + $0xe0] sm:$0xff]  ;;  %v939_v53 = vld [vmem:[%s1318_s3 + $0x98] sm:$0xff]  ;;  %v921_v55 = vld [vmem:[%s1318_s3 + $0x8] sm:$0xff] }
  0x25   :  { %565 = vmatpush.bf16.msrb.mxu1 %v935_v34  ;;  %267 = vmatmul.bf16.vlgmr.msra.gmra.mxu2 %v887_v33  ;;  %v947_v54 = vld [vmem:[%s1318_s3 + $0xd8] sm:$0xff]  ;;  %v929_v56 = vld [vmem:[%s1318_s3 + $0x48] sm:$0xff]  ;;  %v938_v57 = vld [vmem:[%s1318_s3 + $0x90] sm:$0xff] }
  0x26   :  { %281 = vmatmul.bf16.vlgmr.msra.gmra.mxu3 %v887_v33  ;;  %579 = vmatpush.bf16.msrb.mxu2 %v943_v35  ;;  %v946_v58 = vld [vmem:[%s1318_s3 + $0xd0] sm:$0xff]  ;;  %v920_v59 = vld [vmem:[%s1318_s3] sm:$0xff]  ;;  %v937_v61 = vld [vmem:[%s1318_s3 + $0x88] sm:$0xff] }
  0x27   :  { %593 = vmatpush.bf16.msrb.mxu3 %v951_v37  ;;  %v928_v60 = vld [vmem:[%s1318_s3 + $0x40] sm:$0xff]  ;;  %v945_v62 = vld [vmem:[%s1318_s3 + $0xc8] sm:$0xff] }
  0x28   :  { %552 = vmatpush.bf16.msrb.mxu0 %v926_v36  ;;  %v936_v63 = vld [vmem:[%s1318_s3 + $0x80] sm:$0xff] }
  0x29   :  { %566 = vmatpush.bf16.msrb.mxu1 %v934_v38  ;;  %v944_v0 = vld [vmem:[%s1318_s3 + $0xc0] sm:$0xff] }
  0x2a   :  { %580 = vmatpush.bf16.msrb.mxu2 %v942_v39  ;;  %v55_v3 = vld [vmem:[%s1317_s2] sm:$0xf] }
  0x2b   :  { %594 = vmatpush.bf16.msrb.mxu3 %v950_v41  ;;  %v57_v4 = vperm.slane %v55_v3, 0  ;;  %v58_v5 = vperm.slane %v55_v3, 1  ;;  %v59_v15 = vperm.slane %v55_v3, 2  ;;  %v60_v17 = vperm.slane %v55_v3, 3  ;;  %v955_v27 = vld [vmem:[%s1319_s4] ss:$0 sm:$0xff] }
  0x2c   :  { %553 = vmatpush.bf16.msrb.mxu0 %v925_v40  ;;  %s983_s4 = smov 128  }
  0x2d   :  { %567 = vmatpush.bf16.msrb.mxu1 %v933_v42 }
  0x2e   :  { %581 = vmatpush.bf16.msrb.mxu2 %v941_v43 }
  0x2f   :  { %595 = vmatpush.bf16.msrb.mxu3 %v949_v45 }
  0x30   :  { %554 = vmatpush.bf16.msrb.mxu0 %v924_v44 }
  0x31   :  { %568 = vmatpush.bf16.msrb.mxu1 %v932_v46 }
  0x32   :  { %582 = vmatpush.bf16.msrb.mxu2 %v940_v49 }
  0x33   :  { %596 = vmatpush.bf16.msrb.mxu3 %v948_v50 }
  0x34   :  { %555 = vmatpush.bf16.msrb.mxu0 %v923_v47 }
  0x35   :  { %569 = vmatpush.bf16.msrb.mxu1 %v931_v48 }
  0x36   :  { %583 = vmatpush.bf16.msrb.mxu2 %v939_v53 }
  0x37   :  { %597 = vmatpush.bf16.msrb.mxu3 %v947_v54 }
  0x38   :  { %556 = vmatpush.bf16.msrb.mxu0 %v922_v51 }
  0x39   :  { %570 = vmatpush.bf16.msrb.mxu1 %v930_v52 }
  0x3a   :  { %584 = vmatpush.bf16.msrb.mxu2 %v938_v57 }
  0x3b   :  { %598 = vmatpush.bf16.msrb.mxu3 %v946_v58 }
  0x3c   :  { %557 = vmatpush.bf16.msrb.mxu0 %v921_v55 }
  0x3d   :  { %571 = vmatpush.bf16.msrb.mxu1 %v929_v56 }
  0x3e   :  { %585 = vmatpush.bf16.msrb.mxu2 %v937_v61 }
  0x3f   :  { %599 = vmatpush.bf16.msrb.mxu3 %v945_v62 }
  0x40   :  { %558 = vmatpush.bf16.msrb.mxu0 %v920_v59 }
  0x41   :  { %572 = vmatpush.bf16.msrb.mxu1 %v928_v60 }
  0x42   :  { %586 = vmatpush.bf16.msrb.mxu2 %v936_v63 }
  0x43   :  { %600 = vmatpush.bf16.msrb.mxu3 %v944_v0 }
  0xa0   :  { %v240_v1 = vpop.f32.mrf.mxu0 }
  0xa1   :  { %v254_v2 = vpop.f32.mrf.mxu1  ;;  %v241_v6 = vadd.f32 %v240_v1, %v57_v4 }
  0xa2   :  { %v255_v8 = vadd.f32 %v254_v2, %v58_v5 }
  0xa8   :  { %v268_v7 = vpop.f32.mrf.mxu2  ;;  %v242_v10 = vpop.f32.mrf.mxu0 }
  0xa9   :  { %v282_v9 = vpop.f32.mrf.mxu3  ;;  %v243_v11 = vadd.f32 %v242_v10, %v57_v4  ;;  %v256_v12 = vpop.f32.mrf.mxu1  ;;  %v269_v19 = vadd.f32 %v268_v7, %v59_v15 }
  0xaa   :  { %v257_v13 = vadd.f32 %v256_v12, %v58_v5  ;;  %v283_v22 = vadd.f32 %v282_v9, %v60_v17 }
  0xab   :  { %v287_v14 = vpack.c.bf16 %v243_v11, %v241_v6 }
  0xac   :  { %v288_v16 = vpack.c.bf16 %v257_v13, %v255_v8 }
  0xad   :  { %559 = vmatmul.bf16.vlgmr.msrb.gmra.mxu0 %v287_v14 }
  0xae   :  { %573 = vmatmul.bf16.vlgmr.msrb.gmra.mxu1 %v288_v16 }
  0xb0   :  { %v270_v18 = vpop.f32.mrf.mxu2 }
  0xb1   :  { %v271_v20 = vadd.f32 %v270_v18, %v59_v15  ;;  %v284_v21 = vpop.f32.mrf.mxu3 }
  0xb2   :  { %v285_v23 = vadd.f32 %v284_v21, %v60_v17 }
  0xb3   :  { %v289_v24 = vpack.c.bf16 %v271_v20, %v269_v19 }
  0xb4   :  { %v290_v25 = vpack.c.bf16 %v285_v23, %v283_v22 }
  0xb5   :  { %587 = vmatmul.bf16.vlgmr.msrb.gmra.mxu2 %v289_v24 }
  0xb6   :  { %601 = vmatmul.bf16.vlgmr.msrb.gmra.mxu3 %v290_v25 }
 0x12a   :  { %v560_v26 = vpop.f32.mrf.mxu0 }
 0x12b   :  { %v561_v28 = vadd.f32 %v955_v27, %v560_v26  ;;  %v574_v29 = vpop.f32.mrf.mxu1 }
 0x12d   :  { %v575_v30 = vadd.f32 %v574_v29, %v561_v28 }
 0x132   :  { %v562_v31 = vpop.f32.mrf.mxu0 }
 0x133   :  { %v563_v35 = vadd.f32 %v955_v27, %v562_v31  ;;  %v576_v37 = vpop.f32.mrf.mxu1 }
 0x135   :  { %v577_v38 = vadd.f32 %v576_v37, %v563_v35 }
 0x138   :  { %v588_v32 = vpop.f32.mrf.mxu2 }
 0x139   :  { %v589_v33 = vadd.f32 %v588_v32, %v575_v30  ;;  %v602_v34 = vpop.f32.mrf.mxu3 }
 0x13b   :  { %v603_v36 = vadd.f32 %v602_v34, %v589_v33 }
 0x13d   :  { %607 = vst [vmem:[#allocation2] sm:$0xff] %v603_v36 }
 0x140   :  { %v590_v39 = vpop.f32.mrf.mxu2 }
 0x141   :  { %v591_v40 = vadd.f32 %v590_v39, %v577_v38  ;;  %v604_v41 = vpop.f32.mrf.mxu3 }
 0x143   :  { %v605_v42 = vadd.f32 %v604_v41, %v591_v40 }
 0x145   :  { %608 = vst [vmem:[#allocation2 + $0x8] sm:$0xff] %v605_v42 }
 0x146   :  { %621 = dma.vmem_to_hbm [thread:$0]  %s614_s9, 256, %s616_s12, [#allocation3], %s983_s4, %s983_s4, %s984_s13  }
 0x147   :  { %980 = dma.done.wait [#allocation3], 256  }
 0x148   :  { %981 = vsyncadd [#allocation3], 4294967040 }
 0x149   :  { %626 = vsyncpa [#allocation3], 1 }

</bundles_post_ra>
